<compile_context>
chip_gen: v6e
topology: v6e:2x2x1
jax: 0.10.0
libtpu: 0.0.40
codegen_flags: <defaults>
</compile_context>

<pallas_src>
import functools
import math

import jax
import jax.numpy as jnp
from jax.experimental import pallas as pl
from jax.experimental.pallas import tpu as pltpu

# Deterministic "hyperparameters" (module __init__ args), closed over statically.
GAMMA = 2.0
POS_WEIGHT = 3.0

_LANE = 128
_SUBLANE = 8
# Per-buffer block budget ~1 MiB of f32 (2048*128 elements). 2 inputs +
# 1 output, double-buffered -> worst case ~6 MiB VMEM.
_BLOCK_ELEMS = 2048 * 128
_MAX_COL_TILE = 512        # wide lane tiles -> long unmasked vst/DMA bursts
_MIN_SPLIT_ROWS = 256      # above this, force >= 2 row blocks (pipelining +
                           # v7x megacore sharding of the parallel axis)

_LOG_EPS = math.log(1e-8)  # log(clamp(p, 1e-8)) == max(log p, log 1e-8)


def _focal_loss_kernel(pred_ref, true_ref, out_ref, *, gamma, w_p):
    x = pred_ref[...].astype(jnp.float32)
    y = true_ref[...].astype(jnp.float32)

    # Numerically-stable log-sigmoid pair with a single exp + single log (EUP).
    log_p_raw = jnp.minimum(x, 0.0) - jnp.log(1.0 + jnp.exp(-jnp.abs(x)))
    log_1mp_raw = log_p_raw - x          # log sigmoid(-x) == log(1 - p), VALU only

    # torch: log(p.clamp(min=1e-8)) — identical to clamping the log (monotone).
    log_p = jnp.maximum(log_p_raw, _LOG_EPS)
    log_1mp = jnp.maximum(log_1mp_raw, _LOG_EPS)

    if gamma == 2.0:
        # Recover p with one exp; the float powers become VALU squares.
        # (On v7x, if a bundle dump ever shows the EUP slot binding, this exp
        #  can be replaced by t = exp(-|x|); p = where(x>=0, 1, t) *
        #  pl.reciprocal(1+t, approx=True). Kept exact here for all chips.)
        p = jnp.exp(log_p_raw)
        w_pos = jnp.square(1.0 - p)      # (1 - p) ** 2
        w_neg = jnp.square(p)            # p ** 2
    else:
        # Arbitrary gamma: reuse the logs, x**gamma = exp(gamma * log x).
        w_pos = jnp.exp(gamma * log_1mp_raw)
        w_neg = jnp.exp(gamma * log_p_raw)

    loss = -w_p * w_pos * y * log_p - w_neg * (1.0 - y) * log_1mp
    out_ref[...] = loss.astype(out_ref.dtype)


def _round_up(x, m):
    return -(-x // m) * m


def _round_down(x, m):
    return (x // m) * m


def _choose_block(rows, cols):
    """Pick a layout-legal (tile_rows, tile_cols) for a (rows, cols) f32 slab."""
    # Lane (last) dim: keep the natural trailing dim when small (full-dim
    # blocks are always legal even if not a multiple of 128); tile 512-wide
    # when large (multiple of 128, ragged tail handled by the cdiv grid).
    tc = cols if cols <= _MAX_COL_TILE else _MAX_COL_TILE
    padded_tc = max(_round_up(tc, _LANE), _LANE)   # VMEM lane footprint
    # Sublane (second-to-last) dim: fill the per-buffer budget, multiple of 8.
    tr_budget = max(_SUBLANE, _round_down(_BLOCK_ELEMS // padded_tc, _SUBLANE))
    if rows <= tr_budget:
        if rows > _MIN_SPLIT_ROWS:
            # >= 2 row blocks: restores DMA/compute double-buffering and lets
            # v7x shard the "parallel" axis across its two TensorCores.
            tr = _round_up((rows + 1) // 2, _SUBLANE)
        else:
            tr = rows                              # full dim -> always legal
    else:
        tr = tr_budget
    return tr, tc


def focal_loss(y_pred, y_true, *, gamma=GAMMA, pos_weight=POS_WEIGHT):
    """Elementwise binary focal loss; output shape/dtype == y_pred's."""
    assert y_pred.shape == y_true.shape, (y_pred.shape, y_true.shape)
    orig_shape = y_pred.shape
    out_dtype = y_pred.dtype
    n = y_pred.size
    if n == 0:
        return jnp.zeros(orig_shape, out_dtype)

    # Copy-free 2-D presentation: natural trailing dim = lane axis, collapse
    # all leading dims into rows. No padding and no output slicing.
    cols = orig_shape[-1] if y_pred.ndim >= 2 else n
    rows = n // cols
    pred2d = y_pred.reshape(rows, cols)
    true2d = y_true.reshape(rows, cols)

    tr, tc = _choose_block(rows, cols)
    grid = (pl.cdiv(rows, tr), pl.cdiv(cols, tc))

    kernel = functools.partial(_focal_loss_kernel, gamma=gamma, w_p=pos_weight)
    spec = pl.BlockSpec((tr, tc), lambda i, j: (i, j))

    out2d = pl.pallas_call(
        kernel,
        out_shape=jax.ShapeDtypeStruct((rows, cols), out_dtype),
        grid_spec=pltpu.PrefetchScalarGridSpec(
            num_scalar_prefetch=0,
            grid=grid,
            in_specs=[spec, spec],
            out_specs=spec,
        ),
        compiler_params=pltpu.CompilerParams(
            dimension_semantics=("parallel", "parallel")),
    )(pred2d, true2d)

    return out2d.reshape(orig_shape)


def _reference_focal_loss(y_pred, y_true, gamma=GAMMA, w_p=POS_WEIGHT):
    p = jax.nn.sigmoid(y_pred.astype(jnp.float32))
    y = y_true.astype(jnp.float32)
    pos = -w_p * (1.0 - p) ** gamma * y * jnp.log(jnp.maximum(p, 1e-8))
    neg = -(p ** gamma) * (1.0 - y) * jnp.log(jnp.maximum(1.0 - p, 1e-8))
    return (pos + neg).astype(y_pred.dtype)


if __name__ == "__main__":
    key = jax.random.PRNGKey(0)
    k1, k2 = jax.random.split(key)

    # Small shape consistent with a dense binary-classification head output.
    shape = (2, 4, 16, 16)
    y_pred = jax.random.normal(k1, shape, dtype=jnp.float32)  # logits
    y_true = (jax.random.uniform(k2, shape) > 0.5).astype(jnp.float32)

    out = focal_loss(y_pred, y_true)
    out = jax.block_until_ready(out)

    ref = _reference_focal_loss(y_pred, y_true)
    assert out.shape == y_pred.shape and out.dtype == y_pred.dtype
    assert jnp.allclose(out, ref, atol=1e-5, rtol=1e-5), "mismatch vs reference"

    print("KERNEL_OK")
</pallas_src>

<mosaic_0001>
module attributes {stable_mosaic.version = 11 : i64} {
  func.func @_focal_loss_kernel(%arg0: i32, %arg1: i32, %arg2: memref<128x16xf32, #tpu.memory_space<vmem>>, %arg3: memref<128x16xf32, #tpu.memory_space<vmem>>, %arg4: memref<128x16xf32, #tpu.memory_space<vmem>>) attributes {dimension_semantics = [#tpu.dimension_semantics<parallel>, #tpu.dimension_semantics<parallel>], iteration_bounds = array<i64: 1, 1>, scalar_prefetch = 0 : i64, scratch_operands = 0 : i64, tpu.core_type = #tpu.core_type<tc>, window_params = [{transform_indices = @transform_0, window_bounds = array<i64: 128, 16>}, {transform_indices = @transform_1, window_bounds = array<i64: 128, 16>}, {transform_indices = @transform_2, window_bounds = array<i64: 128, 16>}]} {
    %c0 = arith.constant 0 : index
    %c0_0 = arith.constant 0 : index
    %0 = vector.load %arg2[%c0, %c0_0] : memref<128x16xf32, #tpu.memory_space<vmem>>, vector<128x16xf32>
    %c0_1 = arith.constant 0 : index
    %c0_2 = arith.constant 0 : index
    %1 = vector.load %arg3[%c0_1, %c0_2] : memref<128x16xf32, #tpu.memory_space<vmem>>, vector<128x16xf32>
    %cst = arith.constant 0.000000e+00 : f32
    %2 = vector.broadcast %cst : f32 to vector<128x16xf32>
    %3 = arith.minimumf %0, %2 : vector<128x16xf32>
    %4 = math.absf %0 : vector<128x16xf32>
    %cst_3 = arith.constant 0.000000e+00 : f32
    %5 = vector.broadcast %cst_3 : f32 to vector<128x16xf32>
    %6 = arith.subf %5, %4 : vector<128x16xf32>
    %7 = math.exp %6 : vector<128x16xf32>
    %cst_4 = arith.constant 1.000000e+00 : f32
    %8 = vector.broadcast %cst_4 : f32 to vector<128x16xf32>
    %9 = arith.addf %8, %7 : vector<128x16xf32>
    %10 = math.log %9 : vector<128x16xf32>
    %11 = arith.subf %3, %10 : vector<128x16xf32>
    %12 = arith.subf %11, %0 : vector<128x16xf32>
    %cst_5 = arith.constant -18.420681 : f32
    %13 = vector.broadcast %cst_5 : f32 to vector<128x16xf32>
    %14 = arith.maximumf %11, %13 : vector<128x16xf32>
    %cst_6 = arith.constant -18.420681 : f32
    %15 = vector.broadcast %cst_6 : f32 to vector<128x16xf32>
    %16 = arith.maximumf %12, %15 : vector<128x16xf32>
    %17 = math.exp %11 : vector<128x16xf32>
    %cst_7 = arith.constant 1.000000e+00 : f32
    %18 = vector.broadcast %cst_7 : f32 to vector<128x16xf32>
    %19 = arith.subf %18, %17 : vector<128x16xf32>
    %20 = arith.mulf %19, %19 : vector<128x16xf32>
    %21 = arith.mulf %17, %17 : vector<128x16xf32>
    %cst_8 = arith.constant -3.000000e+00 : f32
    %22 = vector.broadcast %cst_8 : f32 to vector<128x16xf32>
    %23 = arith.mulf %22, %20 : vector<128x16xf32>
    %24 = arith.mulf %23, %1 : vector<128x16xf32>
    %25 = arith.mulf %24, %14 : vector<128x16xf32>
    %cst_9 = arith.constant 1.000000e+00 : f32
    %26 = vector.broadcast %cst_9 : f32 to vector<128x16xf32>
    %27 = arith.subf %26, %1 : vector<128x16xf32>
    %28 = arith.mulf %21, %27 : vector<128x16xf32>
    %29 = arith.mulf %28, %16 : vector<128x16xf32>
    %30 = arith.subf %25, %29 : vector<128x16xf32>
    %c0_10 = arith.constant 0 : index
    %c0_11 = arith.constant 0 : index
    %31 = vector.load %arg4[%c0_10, %c0_11] : memref<128x16xf32, #tpu.memory_space<vmem>>, vector<128x16xf32>
    tpu.vector_store %arg4[%c0_10, %c0_11], %30 {strides = array<i32>} : memref<128x16xf32, #tpu.memory_space<vmem>>, vector<128x16xf32>,
    return
  }
  func.func @transform_0(%arg0: i32, %arg1: i32) -> (i32, i32) {
    %c0_i32 = arith.constant 0 : i32
    return %arg0, %arg1 : i32, i32
  }
  func.func @transform_1(%arg0: i32, %arg1: i32) -> (i32, i32) {
    %c0_i32 = arith.constant 0 : i32
    return %arg0, %arg1 : i32, i32
  }
  func.func @transform_2(%arg0: i32, %arg1: i32) -> (i32, i32) {
    %c0_i32 = arith.constant 0 : i32
    return %arg0, %arg1 : i32, i32
  }
}

</mosaic_0001>

<bundles_post_ra>
// kernel: tpu_custom_call.1
= control target key start
LH: loop header
LB: loop body
LE: loop exit
PB: predicated region body
PF: predicated region fallthrough
CT: control target
= control target key end

     0   :  { %vm427_vm0 = vcmask 130048   ;;  %s995_s0 = inlined_call_operand.vmem [shape: f32[128,16], index: 0, kind: input, shape index: {}]   ;;  %s996_s1 = inlined_call_operand.vmem [shape: f32[128,16], index: 1, kind: input, shape index: {}]   ;;  %s997_s2 = inlined_call_operand.vmem [shape: f32[128,16], index: 2, kind: output, shape index: {}]  }
   0x1   :  { %v562_v0 = vld [vmem:[%s995_s0] sm:$0xff]  ;;  %v567_v1 = vld [vmem:[%s995_s0 + $0x8] sm:$0xff]  ;;  %v574_v4 = vld [vmem:[%s995_s0 + $0x10] sm:$0xff] }
   0x2   :  { %v59_v2 = vand.u32 2147483647, %v562_v0  ;;  %v60_v3 = vand.u32 2147483647, %v567_v1  ;;  %v579_v5 = vld [vmem:[%s995_s0 + $0x18] sm:$0xff]  ;;  %v586_v10 = vld [vmem:[%s995_s0 + $0x20] sm:$0xff] }
   0x3   :  { %v61_v7 = vand.u32 2147483647, %v574_v4  ;;  %v62_v9 = vand.u32 2147483647, %v579_v5  ;;  %v591_v13 = vld [vmem:[%s995_s0 + $0x28] sm:$0xff]  ;;  %v598_v21 = vld [vmem:[%s995_s0 + $0x30] sm:$0xff] }
   0x4   :  { %v75_v6 = vsub.f32 0.0, %v59_v2  ;;  %v76_v8 = vsub.f32 0.0, %v60_v3  ;;  %v63_v16 = vand.u32 2147483647, %v586_v10  ;;  %v64_v18 = vand.u32 2147483647, %v591_v13 }
   0x5   :  { %v77_v12 = vsub.f32 0.0, %v61_v7  ;;  %v78_v15 = vsub.f32 0.0, %v62_v9  ;;  %v65_v23 = vand.u32 2147483647, %v598_v21  ;;  %v604_v24 = vld [vmem:[%s995_s0 + $0x38] sm:$0xff]  ;;  %v609_v26 = vld [vmem:[%s995_s0 + $0x40] sm:$0xff] }
   0x6   :  { %v91_v11 = vmul.f32 1.442695, %v75_v6  ;;  %v93_v14 = vmul.f32 1.442695, %v76_v8  ;;  %v79_v20 = vsub.f32 0.0, %v63_v16  ;;  %v80_v22 = vsub.f32 0.0, %v64_v18 }
   0x7   :  { %v95_v17 = vmul.f32 1.442695, %v77_v12  ;;  %v97_v19 = vmul.f32 1.442695, %v78_v15  ;;  %v81_v28 = vsub.f32 0.0, %v65_v23  ;;  %v616_v31 = vld [vmem:[%s995_s0 + $0x48] sm:$0xff] }
   0x8   :  { %448 = vpow2.f32 %v91_v11  ;;  %v99_v25 = vmul.f32 1.442695, %v79_v20  ;;  %v101_v27 = vmul.f32 1.442695, %v80_v22  ;;  %v66_v29 = vand.u32 2147483647, %v604_v24 }
   0x9   :  { %450 = vpow2.f32 %v93_v14  ;;  %v67_v30 = vand.u32 2147483647, %v609_v26  ;;  %v103_v32 = vmul.f32 1.442695, %v81_v28  ;;  %v621_v34 = vld [vmem:[%s995_s0 + $0x50] sm:$0xff]  ;;  %v627_v37 = vld [vmem:[%s995_s0 + $0x58] sm:$0xff] }
   0xa   :  { %452 = vpow2.f32 %v95_v17  ;;  %v82_v33 = vsub.f32 0.0, %v66_v29  ;;  %v68_v36 = vand.u32 2147483647, %v616_v31  ;;  %v69_v39 = vand.u32 2147483647, %v621_v34  ;;  %v634_v44 = vld [vmem:[%s995_s0 + $0x60] sm:$0xff] }
   0xb   :  { %454 = vpow2.f32 %v97_v19  ;;  %v83_v35 = vsub.f32 0.0, %v67_v30  ;;  %v70_v42 = vand.u32 2147483647, %v627_v37  ;;  %v71_v50 = vand.u32 2147483647, %v634_v44  ;;  %v640_v51 = vld [vmem:[%s995_s0 + $0x68] sm:$0xff] }
   0xc   :  { %456 = vpow2.f32 %v99_v25  ;;  %v105_v38 = vmul.f32 1.442695, %v82_v33  ;;  %v84_v41 = vsub.f32 0.0, %v68_v36  ;;  %v85_v43 = vsub.f32 0.0, %v69_v39  ;;  %v645_v54 = vld [vmem:[%s995_s0 + $0x70] sm:$0xff]  ;;  %v652_v8 = vld [vmem:[%s995_s0 + $0x78] sm:$0xff] }
   0xd   :  { %458 = vpow2.f32 %v101_v27  ;;  %v107_v40 = vmul.f32 1.442695, %v83_v35  ;;  %v86_v46 = vsub.f32 0.0, %v70_v42  ;;  %v72_v59 = vand.u32 2147483647, %v640_v51  ;;  %v657_v11 = vld [vmem:[%s996_s1] sm:$0xff] }
   0xe   :  { %460 = vpow2.f32 %v103_v32  ;;  %v109_v45 = vmul.f32 1.442695, %v84_v41  ;;  %v111_v47 = vmul.f32 1.442695, %v85_v43  ;;  %v87_v61 = vsub.f32 0.0, %v71_v50  ;;  %v663_v18 = vld [vmem:[%s996_s1 + $0x8] sm:$0xff] }
   0xf   :  { %462 = vpow2.f32 %v105_v38  ;;  %v113_v49 = vmul.f32 1.442695, %v86_v46  ;;  %v73_v62 = vand.u32 2147483647, %v645_v54  ;;  %v88_v7 = vsub.f32 0.0, %v72_v59  ;;  %v668_v19 = vld [vmem:[%s996_s1 + $0x10] sm:$0xff] }
  0x10   :  { %464 = vpow2.f32 %v107_v40  ;;  %v115_v12 = vmul.f32 1.442695, %v87_v61  ;;  %v43_v17 = vmin.f32 %v562_v0, 0.0  ;;  %v74_v20 = vand.u32 2147483647, %v652_v8  ;;  %v675_v25 = vld [vmem:[%s996_s1 + $0x18] sm:$0xff] }
  0x11   :  { %466 = vpow2.f32 %v109_v45  ;;  %v89_v14 = vsub.f32 0.0, %v73_v62  ;;  %v363_v23 = vsub.f32 1.0, %v657_v11  ;;  %v117_v28 = vmul.f32 1.442695, %v88_v7  ;;  %v681_v30 = vld [vmem:[%s996_s1 + $0x20] sm:$0xff]  ;;  %v689_v40 = vld [vmem:[%s996_s1 + $0x28] sm:$0xff] }
  0x12   :  { %468 = vpow2.f32 %v111_v47  ;;  %v44_v29 = vmin.f32 %v567_v1, 0.0  ;;  %v364_v36 = vsub.f32 1.0, %v663_v18  ;;  %v45_v38 = vmin.f32 %v574_v4, 0.0  ;;  %v696_v45 = vld [vmem:[%s996_s1 + $0x30] sm:$0xff]  ;;  %v703_v50 = vld [vmem:[%s996_s1 + $0x38] sm:$0xff]  ;;  %v712_v62 = vld [vmem:[%s996_s1 + $0x40] sm:$0xff] }
  0x13   :  { %470 = vpow2.f32 %v113_v49  ;;  %v119_v33 = vmul.f32 1.442695, %v89_v14  ;;  %v365_v39 = vsub.f32 1.0, %v668_v19  ;;  %v46_v42 = vmin.f32 %v579_v5, 0.0 }
  0x14   :  { %v366_v43 = vsub.f32 1.0, %v675_v25  ;;  %v90_v46 = vsub.f32 0.0, %v74_v20 }
  0x15   :  { %v449_v48 = vpop.eup %448 }
  0x16   :  { %v451_v52 = vpop.eup %450  ;;  %v123_v53 = vadd.f32 1.0, %v449_v48  ;;  %v47_v48 = vmin.f32 %v586_v10, 0.0 }
  0x17   :  { %v453_v55 = vpop.eup %452  ;;  %v124_v56 = vadd.f32 1.0, %v451_v52 }
  0x18   :  { %v455_v57 = vpop.eup %454  ;;  %472 = vlog2.f32 %v123_v53  ;;  %v125_v58 = vadd.f32 1.0, %v453_v55  ;;  %v48_v55 = vmin.f32 %v591_v13, 0.0 }
  0x19   :  { %474 = vlog2.f32 %v124_v56  ;;  %v126_v60 = vadd.f32 1.0, %v455_v57  ;;  %v457_v63 = vpop.eup %456 }
  0x1a   :  { %476 = vlog2.f32 %v125_v58  ;;  %v459_v2 = vpop.eup %458  ;;  %v127_v3 = vadd.f32 1.0, %v457_v63 }
  0x1b   :  { %478 = vlog2.f32 %v126_v60  ;;  %v128_v6 = vadd.f32 1.0, %v459_v2  ;;  %v461_v9 = vpop.eup %460  ;;  %v49_v60 = vmin.f32 %v598_v21, 0.0 }
  0x1c   :  { %480 = vlog2.f32 %v127_v3  ;;  %v129_v15 = vadd.f32 1.0, %v461_v9  ;;  %v463_v16 = vpop.eup %462  ;;  %v121_v9 = vmul.f32 1.442695, %v90_v46  ;;  %v53_v46 = vmin.f32 %v621_v34, 0.0 }
  0x1d   :  { %482 = vlog2.f32 %v128_v6  ;;  %v465_v22 = vpop.eup %464  ;;  %v130_v27 = vadd.f32 1.0, %v463_v16  ;;  %v50_v6 = vmin.f32 %v604_v24, 0.0  ;;  %v51_v16 = vmin.f32 %v609_v26, 0.0 }
  0x1e   :  { %484 = vlog2.f32 %v129_v15  ;;  %v131_v32 = vadd.f32 1.0, %v465_v22  ;;  %v467_v35 = vpop.eup %466 }
  0x1f   :  { %486 = vpow2.f32 %v115_v12  ;;  %v469_v41 = vpop.eup %468  ;;  %v132_v52 = vadd.f32 1.0, %v467_v35 }
  0x20   :  { %488 = vlog2.f32 %v130_v27  ;;  %v471_v47 = vpop.eup %470  ;;  %v133_v57 = vadd.f32 1.0, %v469_v41 }
  0x21   :  { %490 = vlog2.f32 %v131_v32  ;;  %v134_v63 = vadd.f32 1.0, %v471_v47 }
  0x22   :  { %492 = vpow2.f32 %v117_v28 }
  0x23   :  { %494 = vpow2.f32 %v119_v33  ;;  %v52_v33 = vmin.f32 %v616_v31, 0.0 }
  0x24   :  { %496 = vlog2.f32 %v132_v52 }
  0x25   :  { %v473_v53 = vpop.eup %472  ;;  %498 = vlog2.f32 %v133_v57 }
  0x26   :  { %v475_v58 = vpop.eup %474  ;;  %v140_v59 = vmul.f32 0.6931472, %v473_v53  ;;  %500 = vlog2.f32 %v134_v63 }
  0x27   :  { %v477_v2 = vpop.eup %476  ;;  %v142_v3 = vmul.f32 0.6931472, %v475_v58  ;;  %502 = vpow2.f32 %v121_v9 }
  0x28   :  { %v479_v12 = vpop.eup %478  ;;  %v716_v14 = vsub.f32 %v43_v17, %v140_v59  ;;  %v144_v15 = vmul.f32 0.6931472, %v477_v2 }
  0x29   :  { %v719_v20 = vsub.f32 %v44_v29, %v142_v3  ;;  %v146_v22 = vmul.f32 0.6931472, %v479_v12  ;;  %v481_v35 = vpop.eup %480 }
  0x2a   :  { %v235_v28 = vmul.f32 1.442695, %v716_v14  ;;  %v723_v32 = vsub.f32 %v45_v38, %v144_v15  ;;  %v483_v29 = vpop.eup %482  ;;  %v187_v47 = vsub.f32 %v716_v14, %v562_v0  ;;  %v203_v63 = vmax.f32 %v716_v14, -18.420681 }
  0x2b   :  { %v237_v17 = vmul.f32 1.442695, %v719_v20  ;;  %v727_v41 = vsub.f32 %v46_v42, %v146_v22  ;;  %v485_v53 = vpop.eup %484  ;;  %v188_v57 = vsub.f32 %v719_v20, %v567_v1  ;;  %v204_v12 = vmax.f32 %v719_v20, -18.420681 }
  0x2c   :  { %504 = vpow2.f32 %v235_v28  ;;  %v239_v42 = vmul.f32 1.442695, %v723_v32  ;;  %v487_v59 = vpop.eup %486  ;;  %v189_v0 = vsub.f32 %v723_v32, %v574_v4  ;;  %v148_v1 = vmul.f32 0.6931472, %v481_v35 }
  0x2d   :  { %506 = vpow2.f32 %v237_v17  ;;  %v190_v2 = vsub.f32 %v727_v41, %v579_v5  ;;  %v241_v3 = vmul.f32 1.442695, %v727_v41  ;;  %v489_v9 = vpop.eup %488  ;;  %v150_v15 = vmul.f32 0.6931472, %v483_v29 }
  0x2e   :  { %508 = vpow2.f32 %v239_v42  ;;  %v491_v22 = vpop.eup %490  ;;  %v745_v28 = vmax.f32 %v187_v47, -18.420681  ;;  %v152_v17 = vmul.f32 0.6931472, %v485_v53  ;;  %v154_v58 = vmul.f32 0.6931472, %v489_v9 }
  0x2f   :  { %510 = vpow2.f32 %v241_v3  ;;  %v493_v38 = vpop.eup %492  ;;  %v747_v52 = vmax.f32 %v188_v57, -18.420681  ;;  %v752_v5 = vsub.f32 %v47_v48, %v148_v1  ;;  %v754_v27 = vsub.f32 %v48_v55, %v150_v15 }
  0x30   :  { %v495_v42 = vpop.eup %494  ;;  %v756_v35 = vmax.f32 %v189_v0, -18.420681  ;;  %v759_v47 = vmax.f32 %v190_v2, -18.420681  ;;  %v761_v53 = vsub.f32 %v49_v60, %v152_v17  ;;  %v764_v3 = vsub.f32 %v50_v6, %v154_v58 }
  0x31   :  { %v243_v57 = vmul.f32 1.442695, %v752_v5  ;;  %v156_v9 = vmul.f32 0.6931472, %v491_v22  ;;  %v135_v7 = vadd.f32 1.0, %v487_v59  ;;  %v191_v48 = vsub.f32 %v752_v5, %v586_v10  ;;  %v497_v15 = vpop.eup %496 }
  0x32   :  { %v192_v55 = vsub.f32 %v754_v27, %v591_v13  ;;  %v245_v0 = vmul.f32 1.442695, %v754_v27  ;;  %v136_v1 = vadd.f32 1.0, %v493_v38  ;;  %v193_v60 = vsub.f32 %v761_v53, %v598_v21  ;;  %v499_v58 = vpop.eup %498 }
  0x33   :  { %512 = vpow2.f32 %v243_v57  ;;  %v247_v2 = vmul.f32 1.442695, %v761_v53  ;;  %v774_v6 = vadd.f32 1.0, %v495_v42  ;;  %v194_v13 = vsub.f32 %v764_v3, %v604_v24  ;;  %v501_v22 = vpop.eup %500 }
  0x34   :  { %514 = vpow2.f32 %v245_v0  ;;  %v249_v17 = vmul.f32 1.442695, %v764_v3  ;;  %v784_v21 = vsub.f32 %v51_v16, %v156_v9  ;;  %v786_v42 = vpop.eup %502  ;;  %v788_v57 = vmax.f32 %v191_v48, -18.420681 }
  0x35   :  { %516 = vpow2.f32 %v247_v2  ;;  %v790_v59 = vmax.f32 %v192_v55, -18.420681  ;;  %v158_v0 = vmul.f32 0.6931472, %v497_v15  ;;  %v792_v24 = vmax.f32 %v193_v60, -18.420681 }
  0x36   :  { %518 = vlog2.f32 %v135_v7  ;;  %v794_v61 = vmax.f32 %v194_v13, -18.420681  ;;  %v251_v2 = vmul.f32 1.442695, %v784_v21  ;;  %v160_v9 = vmul.f32 0.6931472, %v499_v58 }
  0x37   :  { %520 = vpow2.f32 %v249_v17  ;;  %v797_v29 = vmul.f32 0.6931472, %v501_v22  ;;  %v195_v7 = vsub.f32 %v784_v21, %v609_v26  ;;  %v805_v17 = vsub.f32 %v52_v33, %v158_v0 }
  0x38   :  { %522 = vpow2.f32 %v251_v2 }
  0x39   :  { %v505_v10 = vpop.eup %504  ;;  %524 = vlog2.f32 %v136_v1  ;;  %v815_v1 = vmax.f32 %v195_v7, -18.420681 }
  0x3a   :  { %v507_v38 = vpop.eup %506  ;;  %v267_v56 = vsub.f32 1.0, %v505_v10  ;;  %v299_v16 = vmul.f32 %v505_v10, %v505_v10 }
  0x3b   :  { %v268_v48 = vsub.f32 1.0, %v507_v38  ;;  %v300_v55 = vmul.f32 %v507_v38, %v507_v38  ;;  %v509_v15 = vpop.eup %508 }
  0x3c   :  { %v283_v60 = vmul.f32 %v267_v56, %v267_v56  ;;  %v379_v13 = vmul.f32 %v363_v23, %v299_v16  ;;  %v511_v58 = vpop.eup %510  ;;  %v269_v38 = vsub.f32 1.0, %v509_v15  ;;  %v301_v49 = vmul.f32 %v509_v15, %v509_v15 }
  0x3d   :  { %v284_v10 = vmul.f32 %v268_v48, %v268_v48  ;;  %v380_v22 = vmul.f32 %v364_v36, %v300_v55  ;;  %v270_v26 = vsub.f32 1.0, %v511_v58  ;;  %v302_v2 = vmul.f32 %v511_v58, %v511_v58 }
  0x3e   :  { %v315_v4 = vmul.f32 -3.0, %v283_v60  ;;  %v811_v56 = vsub.f32 %v53_v46, %v160_v9  ;;  %v285_v16 = vmul.f32 %v269_v38, %v269_v38  ;;  %v381_v33 = vmul.f32 %v365_v39, %v301_v49 }
  0x3f   :  { %v316_v23 = vmul.f32 -3.0, %v284_v10  ;;  %v395_v36 = vmul.f32 %v379_v13, %v745_v28  ;;  %v286_v48 = vmul.f32 %v270_v26, %v270_v26  ;;  %v382_v55 = vmul.f32 %v366_v43, %v302_v2 }
  0x40   :  { %v331_v0 = vmul.f32 %v315_v4, %v657_v11  ;;  %v396_v46 = vmul.f32 %v380_v22, %v747_v52  ;;  %v317_v9 = vmul.f32 -3.0, %v285_v16  ;;  %v397_v60 = vmul.f32 %v381_v33, %v756_v35  ;;  %v513_v58 = vpop.eup %512 }
  0x41   :  { %v332_v15 = vmul.f32 %v316_v23, %v663_v18  ;;  %v318_v49 = vmul.f32 -3.0, %v286_v48  ;;  %v398_v11 = vmul.f32 %v382_v55, %v759_v47  ;;  %v253_v28 = vmul.f32 1.442695, %v805_v17  ;;  %v515_v4 = vpop.eup %514 }
  0x42   :  { %v347_v39 = vmul.f32 %v331_v0, %v203_v63  ;;  %v333_v18 = vmul.f32 %v317_v9, %v668_v19  ;;  %v271_v7 = vsub.f32 1.0, %v513_v58  ;;  %v303_v52 = vmul.f32 %v513_v58, %v513_v58  ;;  %v517_v13 = vpop.eup %516 }
  0x43   :  { %v348_v43 = vmul.f32 %v332_v15, %v204_v12  ;;  %v334_v35 = vmul.f32 %v318_v49, %v675_v25  ;;  %v272_v22 = vsub.f32 1.0, %v515_v4  ;;  %v304_v14 = vmul.f32 %v515_v4, %v515_v4  ;;  %v519_v63 = vpop.eup %518 }
  0x44   :  { %v411_v10 = vsub.f32 %v347_v39, %v395_v36  ;;  %v998_v47 = vmax.f32 %v723_v32, -18.420681  ;;  %v287_v2 = vmul.f32 %v271_v7, %v271_v7  ;;  %v999_v23 = vsub.f32 1.0, %v681_v30  ;;  %v521_v12 = vpop.eup %520 }
  0x45   :  { %v412_v38 = vsub.f32 %v348_v43, %v396_v46  ;;  %v1000_v19 = vmax.f32 %v727_v41, -18.420681  ;;  %v288_v16 = vmul.f32 %v272_v22, %v272_v22  ;;  %v1001_v33 = vsub.f32 1.0, %v689_v40  ;;  %v523_v46 = vpop.eup %522 }
  0x46   :  { %v349_v26 = vmul.f32 %v333_v18, %v998_v47  ;;  %v383_v20 = vmul.f32 %v999_v23, %v303_v52  ;;  %428 = vst.msk [vmem:[%s997_s2] sm:$0xff] %vm427_vm0, %v411_v10  ;;  %v273_v36 = vsub.f32 1.0, %v517_v13  ;;  %v319_v48 = vmul.f32 -3.0, %v287_v2  ;;  %v525_v49 = vpop.eup %524 }
  0x47   :  { %v350_v25 = vmul.f32 %v334_v35, %v1000_v19  ;;  %v384_v0 = vmul.f32 %v1001_v33, %v304_v14  ;;  %429 = vst.msk [vmem:[%s997_s2 + $0x8] sm:$0xff] %vm427_vm0, %v412_v38  ;;  %v305_v15 = vmul.f32 %v517_v13, %v517_v13  ;;  %v320_v58 = vmul.f32 -3.0, %v288_v16 }
  0x48   :  { %v413_v32 = vsub.f32 %v349_v26, %v397_v60  ;;  %v399_v55 = vmul.f32 %v383_v20, %v788_v57  ;;  %v289_v39 = vmul.f32 %v273_v36, %v273_v36  ;;  %v335_v4 = vmul.f32 %v319_v48, %v681_v30 }
  0x49   :  { %v414_v9 = vsub.f32 %v350_v25, %v398_v11  ;;  %v400_v41 = vmul.f32 %v384_v0, %v790_v59  ;;  %v1002_v60 = vsub.f32 1.0, %v696_v45  ;;  %v274_v18 = vsub.f32 1.0, %v521_v12 }
  0x4a   :  { %430 = vst.msk [vmem:[%s997_s2 + $0x10] sm:$0xff] %vm427_vm0, %v413_v32  ;;  %v306_v57 = vmul.f32 %v521_v12, %v521_v12  ;;  %v336_v59 = vmul.f32 %v320_v58, %v689_v40  ;;  %v321_v11 = vmul.f32 -3.0, %v289_v39  ;;  %v275_v7 = vsub.f32 1.0, %v523_v46  ;;  %v36_v58 = vld [vmem:[%s996_s1 + $0x48] sm:$0xff] }
  0x4b   :  { %v385_v43 = vmul.f32 %v1002_v60, %v305_v15  ;;  %431 = vst.msk [vmem:[%s997_s2 + $0x18] sm:$0xff] %vm427_vm0, %v414_v9  ;;  %v307_v52 = vmul.f32 %v523_v46, %v523_v46  ;;  %v1003_v13 = vmax.f32 %v752_v5, -18.420681  ;;  %v290_v35 = vmul.f32 %v274_v18, %v274_v18 }
  0x4c   :  { %v1004_v22 = vsub.f32 1.0, %v703_v50  ;;  %v1005_v38 = vmax.f32 %v754_v27, -18.420681  ;;  %v337_v26 = vmul.f32 %v321_v11, %v696_v45  ;;  %v291_v2 = vmul.f32 %v275_v7, %v275_v7 }
  0x4d   :  { %v351_v10 = vmul.f32 %v335_v4, %v1003_v13  ;;  %v401_v30 = vmul.f32 %v385_v43, %v792_v24  ;;  %v1006_v40 = vsub.f32 1.0, %v712_v62  ;;  %v210_v12 = vmax.f32 %v764_v3, -18.420681  ;;  %v38_v4 = vld [vmem:[%s996_s1 + $0x58] sm:$0xff]  ;;  %v933_v43 = vld [vmem:[%s996_s1 + $0x60] sm:$0xff] }
  0x4e   :  { %v386_v14 = vmul.f32 %v1004_v22, %v306_v57  ;;  %v352_v47 = vmul.f32 %v336_v59, %v1005_v38  ;;  %v322_v5 = vmul.f32 -3.0, %v290_v35  ;;  %526 = vpow2.f32 %v253_v28 }
  0x4f   :  { %v387_v23 = vmul.f32 %v1006_v40, %v307_v52  ;;  %v415_v20 = vsub.f32 %v351_v10, %v399_v55  ;;  %v1007_v24 = vmax.f32 %v761_v53, -18.420681  ;;  %v211_v16 = vmax.f32 %v784_v21, -18.420681 }
  0x50   :  { %v416_v19 = vsub.f32 %v352_v47, %v400_v41  ;;  %v323_v33 = vmul.f32 -3.0, %v291_v2  ;;  %v338_v45 = vmul.f32 %v322_v5, %v703_v50  ;;  %v402_v27 = vmul.f32 %v386_v14, %v794_v61 }
  0x51   :  { %v353_v25 = vmul.f32 %v337_v26, %v1007_v24  ;;  %432 = vst.msk [vmem:[%s997_s2 + $0x20] sm:$0xff] %vm427_vm0, %v415_v20  ;;  %v403_v3 = vmul.f32 %v387_v23, %v815_v1  ;;  %v255_v28 = vmul.f32 1.442695, %v811_v56  ;;  %v1008_v0 = vmin.f32 %v627_v37, 0.0 }
  0x52   :  { %433 = vst.msk [vmem:[%s997_s2 + $0x28] sm:$0xff] %vm427_vm0, %v416_v19  ;;  %v339_v21 = vmul.f32 %v323_v33, %v712_v62  ;;  %v164_v50 = vmul.f32 0.6931472, %v519_v63  ;;  %v354_v32 = vmul.f32 %v338_v45, %v210_v12  ;;  %v166_v61 = vmul.f32 0.6931472, %v525_v49  ;;  %v37_v49 = vld [vmem:[%s996_s1 + $0x50] sm:$0xff] }
  0x53   :  { %v417_v53 = vsub.f32 %v353_v25, %v401_v30  ;;  %v892_v36 = vsub.f32 %v1008_v0, %v797_v29  ;;  %528 = vpow2.f32 %v255_v28  ;;  %v138_v55 = vadd.f32 1.0, %v786_v42 }
  0x54   :  { %v355_v1 = vmul.f32 %v339_v21, %v211_v16  ;;  %v418_v62 = vsub.f32 %v354_v32, %v402_v27  ;;  %v1009_v15 = vmin.f32 %v634_v44, 0.0  ;;  %v1010_v29 = vmin.f32 %v640_v51, 0.0 }
  0x55   :  { %434 = vst.msk [vmem:[%s997_s2 + $0x30] sm:$0xff] %vm427_vm0, %v417_v53  ;;  %v257_v48 = vmul.f32 1.442695, %v892_v36  ;;  %530 = vlog2.f32 %v774_v6  ;;  %v196_v41 = vsub.f32 %v805_v17, %v616_v31  ;;  %v372_v39 = vsub.f32 1.0, %v36_v58  ;;  %v938_v31 = vld [vmem:[%s996_s1 + $0x68] sm:$0xff] }
  0x56   :  { %v902_v46 = vsub.f32 %v1009_v15, %v164_v50  ;;  %v906_v63 = vsub.f32 %v1010_v29, %v166_v61  ;;  %v419_v9 = vsub.f32 %v355_v1, %v403_v3  ;;  %435 = vst.msk [vmem:[%s997_s2 + $0x38] sm:$0xff] %vm427_vm0, %v418_v62  ;;  %v197_v59 = vsub.f32 %v811_v56, %v621_v34 }
  0x57   :  { %532 = vpow2.f32 %v257_v48  ;;  %v373_v11 = vsub.f32 1.0, %v37_v49  ;;  %v374_v7 = vsub.f32 1.0, %v38_v4  ;;  %v228_v52 = vmax.f32 %v196_v41, -18.420681 }
  0x58   :  { %v259_v42 = vmul.f32 1.442695, %v902_v46  ;;  %436 = vst.msk [vmem:[%s997_s2 + $0x40] sm:$0xff] %vm427_vm0, %v419_v9  ;;  %v261_v6 = vmul.f32 1.442695, %v906_v63  ;;  %534 = vlog2.f32 %v138_v55  ;;  %v375_v30 = vsub.f32 1.0, %v933_v43 }
  0x59   :  { %v212_v22 = vmax.f32 %v805_v17, -18.420681  ;;  %v198_v14 = vsub.f32 %v892_v36, %v627_v37  ;;  %v376_v38 = vsub.f32 1.0, %v938_v31  ;;  %v57_v47 = vmin.f32 %v645_v54, 0.0 }
  0x5a   :  { %536 = vpow2.f32 %v259_v42  ;;  %v199_v40 = vsub.f32 %v902_v46, %v634_v44  ;;  %v213_v20 = vmax.f32 %v811_v56, -18.420681  ;;  %v229_v12 = vmax.f32 %v197_v59, -18.420681 }
  0x5b   :  { %538 = vpow2.f32 %v261_v6  ;;  %v527_v60 = vpop.eup %526  ;;  %v200_v17 = vsub.f32 %v906_v63, %v640_v51  ;;  %v58_v5 = vmin.f32 %v652_v8, 0.0  ;;  %v214_v33 = vmax.f32 %v892_v36, -18.420681 }
  0x5c   :  { %v276_v18 = vsub.f32 1.0, %v527_v60  ;;  %v308_v57 = vmul.f32 %v527_v60, %v527_v60  ;;  %v230_v56 = vmax.f32 %v198_v14, -18.420681  ;;  %v231_v21 = vmax.f32 %v199_v40, -18.420681 }
  0x5d   :  { %v232_v61 = vmax.f32 %v200_v17, -18.420681 }
  0x5e   :  { %v292_v13 = vmul.f32 %v276_v18, %v276_v18  ;;  %v388_v10 = vmul.f32 %v372_v39, %v308_v57 }
  0x60   :  { %v529_v35 = vpop.eup %528  ;;  %v324_v26 = vmul.f32 -3.0, %v292_v13  ;;  %v404_v24 = vmul.f32 %v388_v10, %v228_v52  ;;  %v216_v13 = vmax.f32 %v906_v63, -18.420681 }
  0x61   :  { %v277_v2 = vsub.f32 1.0, %v529_v35  ;;  %v309_v34 = vmul.f32 %v529_v35, %v529_v35 }
  0x62   :  { %v531_v23 = vpop.eup %530  ;;  %v340_v19 = vmul.f32 %v324_v26, %v36_v58 }
  0x63   :  { %v293_v25 = vmul.f32 %v277_v2, %v277_v2  ;;  %v389_v16 = vmul.f32 %v373_v11, %v309_v34  ;;  %v168_v3 = vmul.f32 0.6931472, %v531_v23  ;;  %v215_v11 = vmax.f32 %v902_v46, -18.420681  ;;  %v42_v23 = vld [vmem:[%s996_s1 + $0x78] sm:$0xff] }
  0x64   :  { %v533_v37 = vpop.eup %532  ;;  %v356_v28 = vmul.f32 %v340_v19, %v212_v22  ;;  %v378_v19 = vsub.f32 1.0, %v42_v23 }
  0x65   :  { %v278_v45 = vsub.f32 1.0, %v533_v37  ;;  %v310_v27 = vmul.f32 %v533_v37, %v533_v37  ;;  %v535_v44 = vpop.eup %534  ;;  %v325_v53 = vmul.f32 -3.0, %v293_v25  ;;  %v405_v50 = vmul.f32 %v389_v16, %v229_v12 }
  0x66   :  { %v420_v48 = vsub.f32 %v356_v28, %v404_v24  ;;  %v185_v42 = vsub.f32 %v57_v47, %v168_v3  ;;  %v170_v39 = vmul.f32 0.6931472, %v535_v44 }
  0x67   :  { %v537_v0 = vpop.eup %536  ;;  %v294_v51 = vmul.f32 %v278_v45, %v278_v45  ;;  %v390_v32 = vmul.f32 %v374_v7, %v310_v27  ;;  %v341_v55 = vmul.f32 %v325_v53, %v37_v49 }
  0x68   :  { %v539_v1 = vpop.eup %538  ;;  %v279_v62 = vsub.f32 1.0, %v537_v0  ;;  %v311_v15 = vmul.f32 %v537_v0, %v537_v0  ;;  %437 = vst.msk [vmem:[%s997_s2 + $0x48] sm:$0xff] %vm427_vm0, %v420_v48  ;;  %v263_v35 = vmul.f32 1.442695, %v185_v42  ;;  %v186_v22 = vsub.f32 %v58_v5, %v170_v39 }
  0x69   :  { %v326_v29 = vmul.f32 -3.0, %v294_v51  ;;  %v280_v36 = vsub.f32 1.0, %v539_v1  ;;  %v312_v9 = vmul.f32 %v539_v1, %v539_v1  ;;  %v357_v58 = vmul.f32 %v341_v55, %v213_v20 }
  0x6a   :  { %v295_v6 = vmul.f32 %v279_v62, %v279_v62  ;;  %v391_v41 = vmul.f32 %v375_v30, %v311_v15  ;;  %v406_v18 = vmul.f32 %v390_v32, %v230_v56  ;;  %540 = vpow2.f32 %v263_v35 }
  0x6b   :  { %v342_v60 = vmul.f32 %v326_v29, %v38_v4  ;;  %v296_v57 = vmul.f32 %v280_v36, %v280_v36  ;;  %v392_v59 = vmul.f32 %v376_v38, %v312_v9  ;;  %v421_v49 = vsub.f32 %v357_v58, %v405_v50 }
  0x6c   :  { %v327_v7 = vmul.f32 -3.0, %v295_v6  ;;  %v407_v4 = vmul.f32 %v391_v41, %v231_v21  ;;  %v265_v26 = vmul.f32 1.442695, %v186_v22  ;;  %v202_v12 = vsub.f32 %v186_v22, %v652_v8 }
  0x6d   :  { %v358_v52 = vmul.f32 %v342_v60, %v214_v33  ;;  %v328_v10 = vmul.f32 -3.0, %v296_v57  ;;  %438 = vst.msk [vmem:[%s997_s2 + $0x50] sm:$0xff] %vm427_vm0, %v421_v49  ;;  %v408_v47 = vmul.f32 %v392_v59, %v232_v61  ;;  %v217_v3 = vmax.f32 %v185_v42, -18.420681 }
  0x6e   :  { %v343_v30 = vmul.f32 %v327_v7, %v933_v43  ;;  %542 = vpow2.f32 %v265_v26  ;;  %v41_v43 = vld [vmem:[%s996_s1 + $0x70] sm:$0xff]  ;;  %v234_v33 = vmax.f32 %v202_v12, -18.420681  ;;  %v218_v21 = vmax.f32 %v186_v22, -18.420681 }
  0x6f   :  { %v422_v14 = vsub.f32 %v358_v52, %v406_v18  ;;  %v344_v38 = vmul.f32 %v328_v10, %v938_v31  ;;  %v201_v31 = vsub.f32 %v185_v42, %v645_v54  ;;  %v377_v40 = vsub.f32 1.0, %v41_v43 }
  0x70   :  { %v359_v46 = vmul.f32 %v343_v30, %v215_v11 }
  0x71   :  { %439 = vst.msk [vmem:[%s997_s2 + $0x58] sm:$0xff] %vm427_vm0, %v422_v14  ;;  %v360_v63 = vmul.f32 %v344_v38, %v216_v13  ;;  %v233_v17 = vmax.f32 %v201_v31, -18.420681 }
  0x72   :  { %v423_v2 = vsub.f32 %v359_v46, %v407_v4 }
  0x73   :  { %v424_v34 = vsub.f32 %v360_v63, %v408_v47 }
  0x74   :  { %440 = vst.msk [vmem:[%s997_s2 + $0x60] sm:$0xff] %vm427_vm0, %v423_v2 }
  0x75   :  { %441 = vst.msk [vmem:[%s997_s2 + $0x68] sm:$0xff] %vm427_vm0, %v424_v34 }
  0x77   :  { %v541_v20 = vpop.eup %540 }
  0x78   :  { %v281_v5 = vsub.f32 1.0, %v541_v20  ;;  %v313_v37 = vmul.f32 %v541_v20, %v541_v20 }
  0x7a   :  { %v297_v25 = vmul.f32 %v281_v5, %v281_v5  ;;  %v393_v16 = vmul.f32 %v377_v40, %v313_v37 }
  0x7b   :  { %v543_v24 = vpop.eup %542 }
  0x7c   :  { %v282_v45 = vsub.f32 1.0, %v543_v24  ;;  %v314_v27 = vmul.f32 %v543_v24, %v543_v24  ;;  %v329_v54 = vmul.f32 -3.0, %v297_v25  ;;  %v409_v44 = vmul.f32 %v393_v16, %v233_v17 }
  0x7e   :  { %v298_v28 = vmul.f32 %v282_v45, %v282_v45  ;;  %v394_v53 = vmul.f32 %v378_v19, %v314_v27  ;;  %v345_v56 = vmul.f32 %v329_v54, %v41_v43 }
  0x80   :  { %v330_v0 = vmul.f32 -3.0, %v298_v28  ;;  %v410_v50 = vmul.f32 %v394_v53, %v234_v33  ;;  %v361_v8 = vmul.f32 %v345_v56, %v217_v3 }
  0x82   :  { %v346_v51 = vmul.f32 %v330_v0, %v42_v23  ;;  %v425_v32 = vsub.f32 %v361_v8, %v409_v44 }
  0x84   :  { %v362_v61 = vmul.f32 %v346_v51, %v218_v21  ;;  %442 = vst.msk [vmem:[%s997_s2 + $0x70] sm:$0xff] %vm427_vm0, %v425_v32 }
  0x86   :  { %v426_v1 = vsub.f32 %v362_v61, %v410_v50 }
  0x88   :  { %443 = vst.msk [vmem:[%s997_s2 + $0x78] sm:$0xff] %vm427_vm0, %v426_v1 }

</bundles_post_ra>
